<compile_context>
chip_gen: v7x
topology: tpu7x:2x2x1
jax: 0.10.0
libtpu: 0.0.40
codegen_flags: <defaults>
</compile_context>

<pallas_src>
import numpy as np
import jax
import jax.numpy as jnp
from jax.experimental import pallas as pl
from jax.experimental.pallas import tpu as pltpu

# ---------------- configuration (small, consistent with the module) ----------
B, T = 2, 5                 # batch of examples, max_action_num
S, ENC = 8, 32              # encoder seq len, enc_dim
C, COL = 6, 24              # max_col_num, col_dim
RNN, ATTN = 32, 32          # rnn_dim, attn_dim
ACT, TYPE = 16, 8           # act_dim, type_dim
N_PRODS = 20                # len(grammar) + 1
N_TYPES = 5
G4 = 4 * RNN                # fused LSTM gate width (i, f, g, o)
STATIC_DIM = ACT + ACT + TYPE   # input slots [a_tm1, parent_prod, parent_type]
DYN_DIM = ATTN + RNN + RNN      # recurrent slots [att_tm1, parent_state, h_prev]
ACC_LANES = 128             # lane-dense accumulator slab
PROD_TEMP = 1.0
COL_TEMP = 1.0
LABEL_SMOOTHING = 0.2
NEG_INF = -1e30

# packed per-step schedule slab layout (lanes)
OFF_GATES = 0
OFF_APPEAR = OFF_GATES + G4
OFF_RULE = OFF_APPEAR + C
OFF_COLSEL = OFF_RULE + N_PRODS
SCHED_W = OFF_COLSEL + C            # 128 + 6 + 20 + 6 = 160


def _log_softmax(x):
    m = jnp.max(x, axis=-1, keepdims=True)
    s = x - m
    return s - jnp.log(jnp.sum(jnp.exp(s), axis=-1, keepdims=True))


# --------------------------- the fused Pallas kernel --------------------------
def decoder_fused_kernel(
    # per-step schedule (blocked along the T grid axis)
    sched_ref,        # (B, SCHED_W)  [gates_pre | appear | rule_sel | col_sel]
    parent_oh_ref,    # (T, B, 1)     one-hot over the history step of the parent state
    # constant inputs (VMEM resident for the whole grid: constant block index)
    enc_ref,          # (B, S, ENC)
    enc_q_ref,        # (B, S, RNN)   enc @ W_attq^T (attention query projection hoisted)
    enc_valid_ref,    # (B, S)
    colptr_ref,       # (B, C+1, ATTN) col_enc @ W_ptr^T / col_temp  ++  column_mem row
    col_invalid_ref,  # (B, C)
    w_dyn_ref,        # (DYN_DIM, 4*RNN)  fused LSTM weight for [att_tm1, parent_state, h_prev]
    w_av_ref,         # (RNN+ENC, ATTN)   att_vec_linear applied to cat([h_t, ctx])
    w_q1_ref, b_q1_ref,       # first Linear of query_vec_to_action_embed
    w_q2r_ref, b_q2r_ref,     # second Linear fused with tied readout (prod_temp folded)
    # output
    acc_ref,          # (B, ACC_LANES)    per-example summed target log-prob (broadcast on lanes)
    # scratch carried across grid steps
    h_sc, c_sc, att_sc, hist_sc,
):
    t = pl.program_id(0)

    @pl.when(t == 0)
    def _init():
        h_sc[...] = jnp.zeros_like(h_sc)
        c_sc[...] = jnp.zeros_like(c_sc)
        att_sc[...] = jnp.zeros_like(att_sc)
        hist_sc[...] = jnp.zeros_like(hist_sc)
        acc_ref[...] = jnp.zeros_like(acc_ref)

    # ---- unpack the per-step schedule slab (static lane slices)
    sched = sched_ref[...]                                       # (B, SCHED_W)
    gates_pre = sched[:, OFF_GATES:OFF_GATES + G4]               # (B, 4*RNN)
    appear = sched[:, OFF_APPEAR:OFF_APPEAR + C]                 # (B, C)
    rule_sel = sched[:, OFF_RULE:OFF_RULE + N_PRODS]             # (B, N_PRODS)
    col_sel = sched[:, OFF_COLSEL:OFF_COLSEL + C]                # (B, C)

    # ---- parent feeding: one-hot contraction over the h history (no dynamic gather)
    par_state = jnp.sum(hist_sc[...] * parent_oh_ref[...], axis=0)            # (B, RNN)

    # ---- nn.LSTMCell (PyTorch gate order i, f, g, o); static input part precomputed,
    #      dynamic part in a single fused matmul.
    # TODO(synk): input_dropout / att_dropout run in eval mode (identity).
    dyn = jnp.concatenate([att_sc[...], par_state, h_sc[...]], axis=-1)       # (B, DYN_DIM)
    gates = gates_pre + jnp.dot(dyn, w_dyn_ref[...],
                                preferred_element_type=jnp.float32)           # (B, 4*RNN)
    i_g = jax.nn.sigmoid(gates[:, 0 * RNN:1 * RNN])
    f_g = jax.nn.sigmoid(gates[:, 1 * RNN:2 * RNN])
    g_g = jnp.tanh(gates[:, 2 * RNN:3 * RNN])
    o_g = jax.nn.sigmoid(gates[:, 3 * RNN:4 * RNN])
    c_t = f_g * c_sc[...] + i_g * g_g
    h_t = o_g * jnp.tanh(c_t)

    # ---- attention over encoder (query projection hoisted into enc_q; MXU contractions)
    # TODO(synk): RelativeAttention's definition is not in the provided source;
    # implemented as masked bilinear attention (score = (h W) . enc, softmax, ctx).
    scores = jnp.einsum('bqr,bsr->bqs', h_t[:, None, :], enc_q_ref[...],
                        preferred_element_type=jnp.float32)[:, 0, :]          # (B, S)
    scores = jnp.where(enc_valid_ref[...] > 0.5, scores, NEG_INF)
    pe = jnp.exp(scores - jnp.max(scores, axis=-1, keepdims=True))
    attn_w = pe * pl.reciprocal(jnp.sum(pe, axis=-1, keepdims=True), approx=True)
    ctx = jnp.einsum('bqs,bse->bqe', attn_w[:, None, :], enc_ref[...],
                     preferred_element_type=jnp.float32)[:, 0, :]             # (B, ENC)

    att_t = jnp.tanh(jnp.dot(jnp.concatenate([h_t, ctx], axis=-1), w_av_ref[...],
                             preferred_element_type=jnp.float32))             # (B, ATTN)

    # ---- production readout: Linear -> tanh -> (Linear fused with tied readout)
    z1 = jnp.tanh(jnp.dot(att_t, w_q1_ref[...], preferred_element_type=jnp.float32)
                  + b_q1_ref[...])
    rule_logits = (jnp.dot(z1, w_q2r_ref[...], preferred_element_type=jnp.float32)
                   + b_q2r_ref[...])                        # prod_temp already folded in
    rule_logp = _log_softmax(rule_logits)                                     # (B, N_PRODS)

    # ---- gated column pointer scoring + masked log-softmax
    # TODO(synk): PointerNet(normalized=False) internals unspecified; implemented as
    # bilinear scoring; column_mem gate computed from the appended row of colptr.
    wc_all = jnp.einsum('bqa,bca->bqc', att_t[:, None, :], colptr_ref[...],
                        preferred_element_type=jnp.float32)[:, 0, :]          # (B, C+1)
    gate = jax.nn.sigmoid(wc_all[:, C:C + 1])                                 # (B, 1)
    w_c = wc_all[:, :C]                                                       # (B, C)
    weights = w_c * (appear * gate + (1.0 - appear) * (1.0 - gate))
    weights = jnp.where(col_invalid_ref[...] > 0.5, NEG_INF, weights)
    col_logp = _log_softmax(weights)                                          # (B, C)

    # ---- on-device target log-prob gather + label smoothing (masks precomputed)
    step_lp = (jnp.sum(rule_logp * rule_sel, axis=-1, keepdims=True)
               + jnp.sum(col_logp * col_sel, axis=-1, keepdims=True))         # (B, 1)
    acc_ref[...] = acc_ref[...] + step_lp

    # ---- carry the recurrent state / record h for parent feeding
    h_sc[...] = h_t
    c_sc[...] = c_t
    att_sc[...] = att_t
    hist_sc[t] = h_t


# --------------------------- pallas_call wrapper -------------------------------
def _step_spec(*tail):
    n = len(tail)
    return pl.BlockSpec((None, *tail), lambda t: (t,) + (0,) * n)


def _const_spec(*shape):
    n = len(shape)
    return pl.BlockSpec(shape, lambda t: (0,) * n)


def decoder_forward_call(sched, parent_oh, enc, enc_q, enc_valid, colptr, col_invalid,
                         w_dyn, w_av, w_q1, b_q1, w_q2r, b_q2r):
    in_specs = [
        _step_spec(B, SCHED_W),        # sched       (T, B, SCHED_W)
        _step_spec(T, B, 1),           # parent_oh   (T, T, B, 1)
        _const_spec(B, S, ENC),        # enc
        _const_spec(B, S, RNN),        # enc_q
        _const_spec(B, S),             # enc_valid
        _const_spec(B, C + 1, ATTN),   # colptr
        _const_spec(B, C),             # col_invalid
        _const_spec(DYN_DIM, G4),      # w_dyn
        _const_spec(RNN + ENC, ATTN),  # w_av
        _const_spec(ATTN, 4 * ATTN),   # w_q1
        _const_spec(1, 4 * ATTN),      # b_q1
        _const_spec(4 * ATTN, N_PRODS),  # w_q2r (fused with tied readout)
        _const_spec(1, N_PRODS),         # b_q2r
    ]
    grid_spec = pltpu.PrefetchScalarGridSpec(
        num_scalar_prefetch=0,
        grid=(T,),
        in_specs=in_specs,
        out_specs=pl.BlockSpec((B, ACC_LANES), lambda t: (0, 0)),
        scratch_shapes=[
            pltpu.VMEM((B, RNN), jnp.float32),      # h_tm1
            pltpu.VMEM((B, RNN), jnp.float32),      # cell_tm1
            pltpu.VMEM((B, ATTN), jnp.float32),     # att_tm1
            pltpu.VMEM((T, B, RNN), jnp.float32),   # h history (parent feeding)
        ],
    )
    return pl.pallas_call(
        decoder_fused_kernel,
        out_shape=jax.ShapeDtypeStruct((B, ACC_LANES), jnp.float32),
        grid_spec=grid_spec,
        compiler_params=pltpu.CompilerParams(dimension_semantics=("arbitrary",)),
    )(sched, parent_oh, enc, enc_q, enc_valid, colptr, col_invalid,
      w_dyn, w_av, w_q1, b_q1, w_q2r, b_q2r)


# ------------------------- parameter init (deterministic) ---------------------
def init_params(key):
    ks = jax.random.split(key, 16)

    def rn(k, shape, scale=0.1):
        return jax.random.normal(k, shape, jnp.float32) * scale

    prod_embed = rn(ks[0], (N_PRODS, ACT))      # nn.Embedding(len(grammar)+1, act_dim)
    type_embed = rn(ks[1], (N_TYPES, TYPE))     # nn.Embedding(n_types, type_dim)
    return dict(
        prod_embed=prod_embed,
        type_embed=type_embed,
        # LSTMCell weights stored transposed (in, 4*rnn), split into the part multiplying
        # the statically-known input slots [a_tm1, parent_prod, parent_type] and the part
        # multiplying the recurrent slots [att_tm1, parent_state, h_prev] (w_hh folded in);
        # b_ih + b_hh fused into one bias.
        w_static=rn(ks[2], (STATIC_DIM, G4)),
        w_dyn=rn(ks[3], (DYN_DIM, G4)),
        b_gates=rn(ks[4], (1, G4)),
        # attention over encoder (bilinear)
        w_attq=rn(ks[5], (RNN, ENC)),
        # att_vec_linear (rnn+enc -> attn, no bias), applied to cat([h_t, ctx])
        w_av=rn(ks[6], (RNN + ENC, ATTN)),
        # query_vec_to_action_embed: Linear(attn, 4*attn) -> tanh -> Linear(4*attn, act)
        w_q1=rn(ks[7], (ATTN, 4 * ATTN)), b_q1=rn(ks[8], (1, 4 * ATTN)),
        w_q2=rn(ks[9], (4 * ATTN, ACT)), b_q2=rn(ks[10], (1, ACT)),
        # tied readout: linear.weight = production_embed.weight
        w_read=prod_embed.T,
        b_read=rn(ks[11], (1, N_PRODS)),
        # column_mem: Linear(attn, 1, bias=False)
        w_colmem=rn(ks[12], (ATTN, 1)),
        # column_pointer_net bilinear weight (attn, col_dim)
        w_ptr=rn(ks[13], (ATTN, COL)),
        # column_rnn_input: Linear(col_dim, act_dim, bias=False), weight (act, col)
        w_colrnn=rn(ks[14], (ACT, COL)),
    )


# ----------------------------- jitted forward (training loss) ------------------
@jax.jit
def forward(params, enc, col_enc, enc_valid, col_invalid,
            a_kind, a_pid, a_cid, frontier_prod_idx, frontier_type_idx,
            parent_oh, appear, rule_sel, col_sel):
    # _prep_step_input, hoisted out of the recurrence: the [a_tm1, parent_prod,
    # parent_type] slots of x depend only on the given target actions, so their gate
    # contribution is computed once here (on device, under jit).
    a_emb_prod = params['prod_embed'][a_pid]                            # (T, B, ACT)
    col_gather = col_enc[jnp.arange(B)[None, :], a_cid]                 # (T, B, COL)
    a_emb_col = jnp.dot(col_gather, params['w_colrnn'].T)               # (T, B, ACT)
    a_emb = (jnp.where((a_kind == 1)[..., None], a_emb_prod, 0.0)
             + jnp.where((a_kind == 2)[..., None], a_emb_col, 0.0))
    p_prod = params['prod_embed'][frontier_prod_idx.T]                  # (T, B, ACT)
    p_type = params['type_embed'][frontier_type_idx.T]                  # (T, B, TYPE)
    static_x = jnp.concatenate([a_emb, p_prod, p_type], axis=-1)        # (T, B, STATIC_DIM)
    static_x = static_x.at[0].set(0.0)                                  # t == 0: x = 0
    gates_pre = jnp.dot(static_x, params['w_static']) + params['b_gates'][None]  # (T, B, 4*RNN)

    # pack all per-step schedule tensors into ONE lane-dense slab -> one DMA per step
    sched = jnp.concatenate([gates_pre, appear, rule_sel, col_sel], axis=-1)  # (T, B, SCHED_W)

    # algebraic fusions / hoists of per-step matmuls (done once here, under jit):
    inv_pt = 1.0 / PROD_TEMP
    w_q2r = jnp.dot(params['w_q2'], params['w_read']) * inv_pt                  # (4*ATTN, N_PRODS)
    b_q2r = (jnp.dot(params['b_q2'], params['w_read']) + params['b_read']) * inv_pt
    enc_q = jnp.einsum('bse,re->bsr', enc, params['w_attq'])                    # (B, S, RNN)
    col_proj = jnp.einsum('bcd,ad->bca', col_enc, params['w_ptr']) * (1.0 / COL_TEMP)
    gate_row = jnp.broadcast_to(params['w_colmem'].T[None], (B, 1, ATTN))
    colptr = jnp.concatenate([col_proj, gate_row], axis=1)                      # (B, C+1, ATTN)

    acc = decoder_forward_call(
        sched, parent_oh,
        enc, enc_q, enc_valid, colptr, col_invalid,
        params['w_dyn'], params['w_av'],
        params['w_q1'], params['b_q1'], w_q2r, b_q2r)

    return -jnp.mean(acc[:, 0])


# -------------------- host-side schedule construction (once) -------------------
def build_schedule(actions, parent_t, col_lens):
    """Turn the per-example action lists into dense per-step tensors (grammar glue)."""
    a_kind = np.zeros((T, B), np.int32)        # 0: zero, 1: production embed, 2: column embed
    a_pid = np.zeros((T, B), np.int32)
    a_cid = np.zeros((T, B), np.int32)
    parent_oh = np.zeros((T, T, B, 1), np.float32)
    appear = np.zeros((T, B, C), np.float32)
    rule_sel = np.zeros((T, B, N_PRODS), np.float32)
    col_sel = np.zeros((T, B, C), np.float32)
    cur_appear = np.zeros((B, C), np.float32)
    for t in range(T):
        appear[t] = cur_appear                 # snapshot BEFORE this step's selections
        for e in range(B):
            n_e = len(actions[e])
            if t >= 1:
                if t < n_e:
                    k, pid, cid = actions[e][t - 1]
                    if k == 0:
                        a_kind[t, e], a_pid[t, e] = 1, pid
                    elif k == 1:
                        a_kind[t, e], a_pid[t, e] = 1, N_PRODS - 1
                    else:
                        a_kind[t, e], a_cid[t, e] = 2, cid
                    p = parent_t[e][t]
                else:
                    p = 0
                parent_oh[t, p, e, 0] = 1.0
            if t < n_e:
                k, pid, cid = actions[e][t]
                if k == 0:
                    rule_sel[t, e, pid] = 1.0
                elif k == 1:
                    rule_sel[t, e, N_PRODS - 1] = 1.0
                else:
                    # target-column log-prob with label smoothing over the valid columns
                    col_sel[t, e, cid] = 1.0 - LABEL_SMOOTHING
                    col_sel[t, e, :col_lens[e]] += LABEL_SMOOTHING / col_lens[e]
                    cur_appear[e, cid] = 1.0   # affects the NEXT step's appear mask
    return a_kind, a_pid, a_cid, parent_oh, appear, rule_sel, col_sel


# --------------------------------- main ---------------------------------------
if __name__ == "__main__":
    key = jax.random.PRNGKey(0)
    k_enc, k_col, k_params = jax.random.split(key, 3)
    params = init_params(k_params)

    enc = jax.random.normal(k_enc, (B, S, ENC), jnp.float32)
    col_enc = jax.random.normal(k_col, (B, C, COL), jnp.float32)
    enc_lens = [8, 6]
    col_lens = [6, 4]

    # synthetic target action sequences: (action_type, prod_id, col_id)
    #   0 = ApplyRuleAction, 1 = ReduceAction, 2 = SpiderSelectColumnAction
    actions = [
        [(0, 3, 0), (0, 7, 0), (2, 0, 2), (2, 0, 0), (1, 0, 0)],
        [(0, 1, 0), (2, 0, 1), (0, 5, 0), (1, 0, 0)],
    ]
    parent_t = [[0, 0, 1, 2, 1], [0, 0, 1, 2]]            # frontier-node creation times
    frontier_prod_idx = np.array([[0, 3, 3, 7, 7], [0, 1, 1, 1, 5]], np.int32)
    frontier_type_idx = np.array([[0, 1, 2, 2, 3], [0, 2, 1, 1, 4]], np.int32)

    a_kind, a_pid, a_cid, parent_oh, appear, rule_sel, col_sel = build_schedule(
        actions, parent_t, col_lens)
    enc_valid = (np.arange(S)[None, :] < np.array(enc_lens)[:, None]).astype(np.float32)
    col_invalid = (np.arange(C)[None, :] >= np.array(col_lens)[:, None]).astype(np.float32)

    loss = forward(params, enc, col_enc,
                   jnp.asarray(enc_valid), jnp.asarray(col_invalid),
                   jnp.asarray(a_kind), jnp.asarray(a_pid), jnp.asarray(a_cid),
                   jnp.asarray(frontier_prod_idx), jnp.asarray(frontier_type_idx),
                   jnp.asarray(parent_oh), jnp.asarray(appear),
                   jnp.asarray(rule_sel), jnp.asarray(col_sel))
    jax.block_until_ready(loss)
    print("KERNEL_OK")
</pallas_src>

<mosaic_0001>
module attributes {stable_mosaic.version = 11 : i64} {
  func.func @decoder_fused_kernel(%arg0: i32, %arg1: memref<1x2x160xf32, #tpu.memory_space<vmem>>, %arg2: memref<1x5x2x1xf32, #tpu.memory_space<vmem>>, %arg3: memref<2x8x32xf32, #tpu.memory_space<vmem>>, %arg4: memref<2x8x32xf32, #tpu.memory_space<vmem>>, %arg5: memref<2x8xf32, #tpu.memory_space<vmem>>, %arg6: memref<2x7x32xf32, #tpu.memory_space<vmem>>, %arg7: memref<2x6xf32, #tpu.memory_space<vmem>>, %arg8: memref<96x128xf32, #tpu.memory_space<vmem>>, %arg9: memref<64x32xf32, #tpu.memory_space<vmem>>, %arg10: memref<32x128xf32, #tpu.memory_space<vmem>>, %arg11: memref<1x128xf32, #tpu.memory_space<vmem>>, %arg12: memref<128x20xf32, #tpu.memory_space<vmem>>, %arg13: memref<1x20xf32, #tpu.memory_space<vmem>>, %arg14: memref<2x128xf32, #tpu.memory_space<vmem>>, %arg15: memref<2x32xf32, #tpu.memory_space<vmem>>, %arg16: memref<2x32xf32, #tpu.memory_space<vmem>>, %arg17: memref<2x32xf32, #tpu.memory_space<vmem>>, %arg18: memref<5x2x32xf32, #tpu.memory_space<vmem>>) attributes {dimension_semantics = [#tpu.dimension_semantics<arbitrary>], iteration_bounds = array<i64: 5>, scalar_prefetch = 0 : i64, scratch_operands = 4 : i64, tpu.core_type = #tpu.core_type<tc>, window_params = [{transform_indices = @transform_0, window_bounds = array<i64: 1, 2, 160>}, {transform_indices = @transform_1, window_bounds = array<i64: 1, 5, 2, 1>}, {pipeline_mode = #tpu.pipeline_mode<synchronous>, transform_indices = @transform_2, window_bounds = array<i64: 2, 8, 32>}, {pipeline_mode = #tpu.pipeline_mode<synchronous>, transform_indices = @transform_3, window_bounds = array<i64: 2, 8, 32>}, {pipeline_mode = #tpu.pipeline_mode<synchronous>, transform_indices = @transform_4, window_bounds = array<i64: 2, 8>}, {pipeline_mode = #tpu.pipeline_mode<synchronous>, transform_indices = @transform_5, window_bounds = array<i64: 2, 7, 32>}, {pipeline_mode = #tpu.pipeline_mode<synchronous>, transform_indices = @transform_6, window_bounds = array<i64: 2, 6>}, {pipeline_mode = #tpu.pipeline_mode<synchronous>, transform_indices = @transform_7, window_bounds = array<i64: 96, 128>}, {pipeline_mode = #tpu.pipeline_mode<synchronous>, transform_indices = @transform_8, window_bounds = array<i64: 64, 32>}, {pipeline_mode = #tpu.pipeline_mode<synchronous>, transform_indices = @transform_9, window_bounds = array<i64: 32, 128>}, {pipeline_mode = #tpu.pipeline_mode<synchronous>, transform_indices = @transform_10, window_bounds = array<i64: 1, 128>}, {pipeline_mode = #tpu.pipeline_mode<synchronous>, transform_indices = @transform_11, window_bounds = array<i64: 128, 20>}, {pipeline_mode = #tpu.pipeline_mode<synchronous>, transform_indices = @transform_12, window_bounds = array<i64: 1, 20>}, {pipeline_mode = #tpu.pipeline_mode<synchronous>, transform_indices = @transform_13, window_bounds = array<i64: 2, 128>}]} {
    %c0_i32 = arith.constant 0 : i32
    %0 = arith.cmpi eq, %arg0, %c0_i32 : i32
    %1 = arith.extui %0 : i1 to i32
    %c0_i32_0 = arith.constant 0 : i32
    %2 = arith.cmpi ne, %1, %c0_i32_0 : i32
    scf.if %2 {
      %cst_78 = arith.constant 0.000000e+00 : f32
      %149 = vector.broadcast %cst_78 : f32 to vector<2x32xf32>
      %c0_79 = arith.constant 0 : index
      %c0_80 = arith.constant 0 : index
      %150 = vector.load %arg15[%c0_79, %c0_80] : memref<2x32xf32, #tpu.memory_space<vmem>>, vector<2x32xf32>
      tpu.vector_store %arg15[%c0_79, %c0_80], %149 {strides = array<i32>} : memref<2x32xf32, #tpu.memory_space<vmem>>, vector<2x32xf32>,
      %cst_81 = arith.constant 0.000000e+00 : f32
      %151 = vector.broadcast %cst_81 : f32 to vector<2x32xf32>
      %c0_82 = arith.constant 0 : index
      %c0_83 = arith.constant 0 : index
      %152 = vector.load %arg16[%c0_82, %c0_83] : memref<2x32xf32, #tpu.memory_space<vmem>>, vector<2x32xf32>
      tpu.vector_store %arg16[%c0_82, %c0_83], %151 {strides = array<i32>} : memref<2x32xf32, #tpu.memory_space<vmem>>, vector<2x32xf32>,
      %cst_84 = arith.constant 0.000000e+00 : f32
      %153 = vector.broadcast %cst_84 : f32 to vector<2x32xf32>
      %c0_85 = arith.constant 0 : index
      %c0_86 = arith.constant 0 : index
      %154 = vector.load %arg17[%c0_85, %c0_86] : memref<2x32xf32, #tpu.memory_space<vmem>>, vector<2x32xf32>
      tpu.vector_store %arg17[%c0_85, %c0_86], %153 {strides = array<i32>} : memref<2x32xf32, #tpu.memory_space<vmem>>, vector<2x32xf32>,
      %cst_87 = arith.constant 0.000000e+00 : f32
      %155 = vector.broadcast %cst_87 : f32 to vector<5x2x32xf32>
      %c0_88 = arith.constant 0 : index
      %c0_89 = arith.constant 0 : index
      %c0_90 = arith.constant 0 : index
      %156 = vector.load %arg18[%c0_88, %c0_89, %c0_90] : memref<5x2x32xf32, #tpu.memory_space<vmem>>, vector<5x2x32xf32>
      tpu.vector_store %arg18[%c0_88, %c0_89, %c0_90], %155 {strides = array<i32>} : memref<5x2x32xf32, #tpu.memory_space<vmem>>, vector<5x2x32xf32>,
      %cst_91 = arith.constant 0.000000e+00 : f32
      %157 = vector.broadcast %cst_91 : f32 to vector<2x128xf32>
      %c0_92 = arith.constant 0 : index
      %c0_93 = arith.constant 0 : index
      %158 = vector.load %arg14[%c0_92, %c0_93] : memref<2x128xf32, #tpu.memory_space<vmem>>, vector<2x128xf32>
      tpu.vector_store %arg14[%c0_92, %c0_93], %157 {strides = array<i32>} : memref<2x128xf32, #tpu.memory_space<vmem>>, vector<2x128xf32>,
    } else {
    }
    %c0 = arith.constant 0 : index
    %c0_1 = arith.constant 0 : index
    %c0_2 = arith.constant 0 : index
    %3 = vector.load %arg1[%c0, %c0_1, %c0_2] : memref<1x2x160xf32, #tpu.memory_space<vmem>>, vector<1x2x160xf32>
    %4 = vector.shape_cast %3 : vector<1x2x160xf32> to vector<2x160xf32>
    %5 = vector.extract_strided_slice %4 {offsets = [0, 0], sizes = [2, 128], strides = [1, 1]} : vector<2x160xf32> to vector<2x128xf32>
    %6 = vector.extract_strided_slice %4 {offsets = [0, 128], sizes = [2, 6], strides = [1, 1]} : vector<2x160xf32> to vector<2x6xf32>
    %7 = vector.extract_strided_slice %4 {offsets = [0, 134], sizes = [2, 20], strides = [1, 1]} : vector<2x160xf32> to vector<2x20xf32>
    %8 = vector.extract_strided_slice %4 {offsets = [0, 154], sizes = [2, 6], strides = [1, 1]} : vector<2x160xf32> to vector<2x6xf32>
    %c0_3 = arith.constant 0 : index
    %c0_4 = arith.constant 0 : index
    %c0_5 = arith.constant 0 : index
    %9 = vector.load %arg18[%c0_3, %c0_4, %c0_5] : memref<5x2x32xf32, #tpu.memory_space<vmem>>, vector<5x2x32xf32>
    %c0_6 = arith.constant 0 : index
    %c0_7 = arith.constant 0 : index
    %c0_8 = arith.constant 0 : index
    %c0_9 = arith.constant 0 : index
    %10 = vector.load %arg2[%c0_6, %c0_7, %c0_8, %c0_9] : memref<1x5x2x1xf32, #tpu.memory_space<vmem>>, vector<1x5x2x1xf32>
    %11 = vector.shape_cast %10 : vector<1x5x2x1xf32> to vector<5x2x1xf32>
    %12 = vector.broadcast %11 : vector<5x2x1xf32> to vector<5x2x32xf32>
    %13 = arith.mulf %9, %12 : vector<5x2x32xf32>
    %cst = arith.constant dense<0.000000e+00> : vector<2x32xf32>
    %14 = vector.multi_reduction <add>, %13, %cst [0] : vector<5x2x32xf32> to vector<2x32xf32>
    %c0_10 = arith.constant 0 : index
    %c0_11 = arith.constant 0 : index
    %15 = vector.load %arg17[%c0_10, %c0_11] : memref<2x32xf32, #tpu.memory_space<vmem>>, vector<2x32xf32>
    %c0_12 = arith.constant 0 : index
    %c0_13 = arith.constant 0 : index
    %16 = vector.load %arg15[%c0_12, %c0_13] : memref<2x32xf32, #tpu.memory_space<vmem>>, vector<2x32xf32>
    %17 = tpu.concatenate %15, %14, %16 in 1 : vector<2x32xf32>, vector<2x32xf32>, vector<2x32xf32> -> vector<2x96xf32>
    %c0_14 = arith.constant 0 : index
    %c0_15 = arith.constant 0 : index
    %18 = vector.load %arg8[%c0_14, %c0_15] : memref<96x128xf32, #tpu.memory_space<vmem>>, vector<96x128xf32>
    %cst_16 = arith.constant dense<0.000000e+00> : vector<2x128xf32>
    %19 = tpu.matmul %17, %18, %cst_16 {dimension_numbers = #tpu.dot_dimension_numbers<[1], [0], [0], [1], [0, 0, 1, 1], [], []>} : vector<2x96xf32>, vector<96x128xf32>, vector<2x128xf32> -> vector<2x128xf32>
    %20 = arith.addf %5, %19 : vector<2x128xf32>
    %21 = vector.extract_strided_slice %20 {offsets = [0, 0], sizes = [2, 32], strides = [1, 1]} : vector<2x128xf32> to vector<2x32xf32>
    %22 = arith.negf %21 : vector<2x32xf32>
    %23 = math.exp %22 : vector<2x32xf32>
    %cst_17 = arith.constant 1.000000e+00 : f32
    %24 = vector.broadcast %cst_17 : f32 to vector<2x32xf32>
    %25 = arith.addf %24, %23 : vector<2x32xf32>
    %26 = arith.divf %24, %25 : vector<2x32xf32>
    %27 = vector.extract_strided_slice %20 {offsets = [0, 32], sizes = [2, 32], strides = [1, 1]} : vector<2x128xf32> to vector<2x32xf32>
    %28 = arith.negf %27 : vector<2x32xf32>
    %29 = math.exp %28 : vector<2x32xf32>
    %cst_18 = arith.constant 1.000000e+00 : f32
    %30 = vector.broadcast %cst_18 : f32 to vector<2x32xf32>
    %31 = arith.addf %30, %29 : vector<2x32xf32>
    %32 = arith.divf %30, %31 : vector<2x32xf32>
    %33 = vector.extract_strided_slice %20 {offsets = [0, 64], sizes = [2, 32], strides = [1, 1]} : vector<2x128xf32> to vector<2x32xf32>
    %34 = math.tanh %33 : vector<2x32xf32>
    %35 = vector.extract_strided_slice %20 {offsets = [0, 96], sizes = [2, 32], strides = [1, 1]} : vector<2x128xf32> to vector<2x32xf32>
    %36 = arith.negf %35 : vector<2x32xf32>
    %37 = math.exp %36 : vector<2x32xf32>
    %cst_19 = arith.constant 1.000000e+00 : f32
    %38 = vector.broadcast %cst_19 : f32 to vector<2x32xf32>
    %39 = arith.addf %38, %37 : vector<2x32xf32>
    %40 = arith.divf %38, %39 : vector<2x32xf32>
    %c0_20 = arith.constant 0 : index
    %c0_21 = arith.constant 0 : index
    %41 = vector.load %arg16[%c0_20, %c0_21] : memref<2x32xf32, #tpu.memory_space<vmem>>, vector<2x32xf32>
    %42 = arith.mulf %32, %41 : vector<2x32xf32>
    %43 = arith.mulf %26, %34 : vector<2x32xf32>
    %44 = arith.addf %42, %43 : vector<2x32xf32>
    %45 = math.tanh %44 : vector<2x32xf32>
    %46 = arith.mulf %40, %45 : vector<2x32xf32>
    %47 = vector.shape_cast %46 : vector<2x32xf32> to vector<2x1x32xf32>
    %c0_22 = arith.constant 0 : index
    %c0_23 = arith.constant 0 : index
    %c0_24 = arith.constant 0 : index
    %48 = vector.load %arg4[%c0_22, %c0_23, %c0_24] : memref<2x8x32xf32, #tpu.memory_space<vmem>>, vector<2x8x32xf32>
    "tpu.trace_start"() <{level = 10 : i32, message = "bqr,bsr->bqs"}> : () -> ()
    %cst_25 = arith.constant dense<0.000000e+00> : vector<2x1x8xf32>
    %49 = tpu.matmul %47, %48, %cst_25 {dimension_numbers = #tpu.dot_dimension_numbers<[2], [2], [1], [1], [0, 0, 0, 1, 1, 1], [0], [0]>} : vector<2x1x32xf32>, vector<2x8x32xf32>, vector<2x1x8xf32> -> vector<2x1x8xf32>
    "tpu.trace_stop"() : () -> ()
    %50 = vector.shape_cast %49 : vector<2x1x8xf32> to vector<2x8xf32>
    %c0_26 = arith.constant 0 : index
    %c0_27 = arith.constant 0 : index
    %51 = vector.load %arg5[%c0_26, %c0_27] : memref<2x8xf32, #tpu.memory_space<vmem>>, vector<2x8xf32>
    %cst_28 = arith.constant 5.000000e-01 : f32
    %52 = vector.broadcast %cst_28 : f32 to vector<2x8xf32>
    %53 = arith.cmpf ogt, %51, %52 : vector<2x8xf32>
    %cst_29 = arith.constant -1.000000e+30 : f32
    %54 = vector.broadcast %cst_29 : f32 to vector<2x8xf32>
    %55 = arith.select %53, %50, %54 : vector<2x8xi1>, vector<2x8xf32>
    %cst_30 = arith.constant dense<0xFF800000> : vector<2xf32>
    %56 = vector.multi_reduction <maximumf>, %55, %cst_30 [1] : vector<2x8xf32> to vector<2xf32>
    %57 = vector.shape_cast %56 : vector<2xf32> to vector<2x1xf32>
    %58 = vector.broadcast %57 : vector<2x1xf32> to vector<2x8xf32>
    %59 = arith.subf %55, %58 : vector<2x8xf32>
    %60 = math.exp %59 : vector<2x8xf32>
    %cst_31 = arith.constant dense<0.000000e+00> : vector<2xf32>
    %61 = vector.multi_reduction <add>, %60, %cst_31 [1] : vector<2x8xf32> to vector<2xf32>
    %62 = vector.shape_cast %61 : vector<2xf32> to vector<2x1xf32>
    %63 = tpu.reciprocal %62 {approx = true} : vector<2x1xf32> -> vector<2x1xf32>
    %64 = vector.broadcast %63 : vector<2x1xf32> to vector<2x8xf32>
    %65 = arith.mulf %60, %64 : vector<2x8xf32>
    %66 = vector.shape_cast %65 : vector<2x8xf32> to vector<2x1x8xf32>
    %c0_32 = arith.constant 0 : index
    %c0_33 = arith.constant 0 : index
    %c0_34 = arith.constant 0 : index
    %67 = vector.load %arg3[%c0_32, %c0_33, %c0_34] : memref<2x8x32xf32, #tpu.memory_space<vmem>>, vector<2x8x32xf32>
    "tpu.trace_start"() <{level = 10 : i32, message = "bqs,bse->bqe"}> : () -> ()
    %cst_35 = arith.constant dense<0.000000e+00> : vector<2x1x32xf32>
    %68 = tpu.matmul %66, %67, %cst_35 {dimension_numbers = #tpu.dot_dimension_numbers<[2], [1], [1], [2], [0, 0, 0, 1, 1, 2], [0], [0]>} : vector<2x1x8xf32>, vector<2x8x32xf32>, vector<2x1x32xf32> -> vector<2x1x32xf32>
    "tpu.trace_stop"() : () -> ()
    %69 = vector.shape_cast %68 : vector<2x1x32xf32> to vector<2x32xf32>
    %70 = tpu.concatenate %46, %69 in 1 : vector<2x32xf32>, vector<2x32xf32> -> vector<2x64xf32>
    %c0_36 = arith.constant 0 : index
    %c0_37 = arith.constant 0 : index
    %71 = vector.load %arg9[%c0_36, %c0_37] : memref<64x32xf32, #tpu.memory_space<vmem>>, vector<64x32xf32>
    %cst_38 = arith.constant dense<0.000000e+00> : vector<2x32xf32>
    %72 = tpu.matmul %70, %71, %cst_38 {dimension_numbers = #tpu.dot_dimension_numbers<[1], [0], [0], [1], [0, 0, 1, 1], [], []>} : vector<2x64xf32>, vector<64x32xf32>, vector<2x32xf32> -> vector<2x32xf32>
    %73 = math.tanh %72 : vector<2x32xf32>
    %c0_39 = arith.constant 0 : index
    %c0_40 = arith.constant 0 : index
    %74 = vector.load %arg10[%c0_39, %c0_40] : memref<32x128xf32, #tpu.memory_space<vmem>>, vector<32x128xf32>
    %cst_41 = arith.constant dense<0.000000e+00> : vector<2x128xf32>
    %75 = tpu.matmul %73, %74, %cst_41 {dimension_numbers = #tpu.dot_dimension_numbers<[1], [0], [0], [1], [0, 0, 1, 1], [], []>} : vector<2x32xf32>, vector<32x128xf32>, vector<2x128xf32> -> vector<2x128xf32>
    %c0_42 = arith.constant 0 : index
    %c0_43 = arith.constant 0 : index
    %76 = vector.load %arg11[%c0_42, %c0_43] : memref<1x128xf32, #tpu.memory_space<vmem>>, vector<1x128xf32>
    %77 = vector.broadcast %76 : vector<1x128xf32> to vector<2x128xf32>
    %78 = arith.addf %75, %77 : vector<2x128xf32>
    %79 = math.tanh %78 : vector<2x128xf32>
    %c0_44 = arith.constant 0 : index
    %c0_45 = arith.constant 0 : index
    %80 = vector.load %arg12[%c0_44, %c0_45] : memref<128x20xf32, #tpu.memory_space<vmem>>, vector<128x20xf32>
    %cst_46 = arith.constant dense<0.000000e+00> : vector<2x20xf32>
    %81 = tpu.matmul %79, %80, %cst_46 {dimension_numbers = #tpu.dot_dimension_numbers<[1], [0], [0], [1], [0, 0, 1, 1], [], []>} : vector<2x128xf32>, vector<128x20xf32>, vector<2x20xf32> -> vector<2x20xf32>
    %c0_47 = arith.constant 0 : index
    %c0_48 = arith.constant 0 : index
    %82 = vector.load %arg13[%c0_47, %c0_48] : memref<1x20xf32, #tpu.memory_space<vmem>>, vector<1x20xf32>
    %83 = vector.broadcast %82 : vector<1x20xf32> to vector<2x20xf32>
    %84 = arith.addf %81, %83 : vector<2x20xf32>
    %cst_49 = arith.constant dense<0xFF800000> : vector<2xf32>
    %85 = vector.multi_reduction <maximumf>, %84, %cst_49 [1] : vector<2x20xf32> to vector<2xf32>
    %86 = vector.shape_cast %85 : vector<2xf32> to vector<2x1xf32>
    %87 = vector.broadcast %86 : vector<2x1xf32> to vector<2x20xf32>
    %88 = arith.subf %84, %87 : vector<2x20xf32>
    %89 = math.exp %88 : vector<2x20xf32>
    %cst_50 = arith.constant dense<0.000000e+00> : vector<2xf32>
    %90 = vector.multi_reduction <add>, %89, %cst_50 [1] : vector<2x20xf32> to vector<2xf32>
    %91 = vector.shape_cast %90 : vector<2xf32> to vector<2x1xf32>
    %92 = math.log %91 : vector<2x1xf32>
    %93 = vector.broadcast %92 : vector<2x1xf32> to vector<2x20xf32>
    %94 = arith.subf %88, %93 : vector<2x20xf32>
    %95 = vector.shape_cast %73 : vector<2x32xf32> to vector<2x1x32xf32>
    %c0_51 = arith.constant 0 : index
    %c0_52 = arith.constant 0 : index
    %c0_53 = arith.constant 0 : index
    %96 = vector.load %arg6[%c0_51, %c0_52, %c0_53] : memref<2x7x32xf32, #tpu.memory_space<vmem>>, vector<2x7x32xf32>
    "tpu.trace_start"() <{level = 10 : i32, message = "bqa,bca->bqc"}> : () -> ()
    %cst_54 = arith.constant dense<0.000000e+00> : vector<2x1x7xf32>
    %97 = tpu.matmul %95, %96, %cst_54 {dimension_numbers = #tpu.dot_dimension_numbers<[2], [2], [1], [1], [0, 0, 0, 1, 1, 1], [0], [0]>} : vector<2x1x32xf32>, vector<2x7x32xf32>, vector<2x1x7xf32> -> vector<2x1x7xf32>
    "tpu.trace_stop"() : () -> ()
    %98 = vector.shape_cast %97 : vector<2x1x7xf32> to vector<2x7xf32>
    %99 = vector.extract_strided_slice %98 {offsets = [0, 6], sizes = [2, 1], strides = [1, 1]} : vector<2x7xf32> to vector<2x1xf32>
    %100 = arith.negf %99 : vector<2x1xf32>
    %101 = math.exp %100 : vector<2x1xf32>
    %cst_55 = arith.constant 1.000000e+00 : f32
    %102 = vector.broadcast %cst_55 : f32 to vector<2x1xf32>
    %103 = arith.addf %102, %101 : vector<2x1xf32>
    %104 = arith.divf %102, %103 : vector<2x1xf32>
    %105 = vector.extract_strided_slice %98 {offsets = [0, 0], sizes = [2, 6], strides = [1, 1]} : vector<2x7xf32> to vector<2x6xf32>
    %106 = vector.broadcast %104 : vector<2x1xf32> to vector<2x6xf32>
    %107 = arith.mulf %6, %106 : vector<2x6xf32>
    %cst_56 = arith.constant 1.000000e+00 : f32
    %108 = vector.broadcast %cst_56 : f32 to vector<2x6xf32>
    %109 = arith.subf %108, %6 : vector<2x6xf32>
    %cst_57 = arith.constant 1.000000e+00 : f32
    %110 = vector.broadcast %cst_57 : f32 to vector<2x1xf32>
    %111 = arith.subf %110, %104 : vector<2x1xf32>
    %112 = vector.broadcast %111 : vector<2x1xf32> to vector<2x6xf32>
    %113 = arith.mulf %109, %112 : vector<2x6xf32>
    %114 = arith.addf %107, %113 : vector<2x6xf32>
    %115 = arith.mulf %105, %114 : vector<2x6xf32>
    %c0_58 = arith.constant 0 : index
    %c0_59 = arith.constant 0 : index
    %116 = vector.load %arg7[%c0_58, %c0_59] : memref<2x6xf32, #tpu.memory_space<vmem>>, vector<2x6xf32>
    %cst_60 = arith.constant 5.000000e-01 : f32
    %117 = vector.broadcast %cst_60 : f32 to vector<2x6xf32>
    %118 = arith.cmpf ogt, %116, %117 : vector<2x6xf32>
    %cst_61 = arith.constant -1.000000e+30 : f32
    %119 = vector.broadcast %cst_61 : f32 to vector<2x6xf32>
    %120 = arith.select %118, %119, %115 : vector<2x6xi1>, vector<2x6xf32>
    %cst_62 = arith.constant dense<0xFF800000> : vector<2xf32>
    %121 = vector.multi_reduction <maximumf>, %120, %cst_62 [1] : vector<2x6xf32> to vector<2xf32>
    %122 = vector.shape_cast %121 : vector<2xf32> to vector<2x1xf32>
    %123 = vector.broadcast %122 : vector<2x1xf32> to vector<2x6xf32>
    %124 = arith.subf %120, %123 : vector<2x6xf32>
    %125 = math.exp %124 : vector<2x6xf32>
    %cst_63 = arith.constant dense<0.000000e+00> : vector<2xf32>
    %126 = vector.multi_reduction <add>, %125, %cst_63 [1] : vector<2x6xf32> to vector<2xf32>
    %127 = vector.shape_cast %126 : vector<2xf32> to vector<2x1xf32>
    %128 = math.log %127 : vector<2x1xf32>
    %129 = vector.broadcast %128 : vector<2x1xf32> to vector<2x6xf32>
    %130 = arith.subf %124, %129 : vector<2x6xf32>
    %131 = arith.mulf %94, %7 : vector<2x20xf32>
    %cst_64 = arith.constant dense<0.000000e+00> : vector<2xf32>
    %132 = vector.multi_reduction <add>, %131, %cst_64 [1] : vector<2x20xf32> to vector<2xf32>
    %133 = vector.shape_cast %132 : vector<2xf32> to vector<2x1xf32>
    %134 = arith.mulf %130, %8 : vector<2x6xf32>
    %cst_65 = arith.constant dense<0.000000e+00> : vector<2xf32>
    %135 = vector.multi_reduction <add>, %134, %cst_65 [1] : vector<2x6xf32> to vector<2xf32>
    %136 = vector.shape_cast %135 : vector<2xf32> to vector<2x1xf32>
    %137 = arith.addf %133, %136 : vector<2x1xf32>
    %c0_66 = arith.constant 0 : index
    %c0_67 = arith.constant 0 : index
    %138 = vector.load %arg14[%c0_66, %c0_67] : memref<2x128xf32, #tpu.memory_space<vmem>>, vector<2x128xf32>
    %139 = vector.broadcast %137 : vector<2x1xf32> to vector<2x128xf32>
    %140 = arith.addf %138, %139 : vector<2x128xf32>
    %c0_68 = arith.constant 0 : index
    %c0_69 = arith.constant 0 : index
    %141 = vector.load %arg14[%c0_68, %c0_69] : memref<2x128xf32, #tpu.memory_space<vmem>>, vector<2x128xf32>
    tpu.vector_store %arg14[%c0_68, %c0_69], %140 {strides = array<i32>} : memref<2x128xf32, #tpu.memory_space<vmem>>, vector<2x128xf32>,
    %c0_70 = arith.constant 0 : index
    %c0_71 = arith.constant 0 : index
    %142 = vector.load %arg15[%c0_70, %c0_71] : memref<2x32xf32, #tpu.memory_space<vmem>>, vector<2x32xf32>
    tpu.vector_store %arg15[%c0_70, %c0_71], %46 {strides = array<i32>} : memref<2x32xf32, #tpu.memory_space<vmem>>, vector<2x32xf32>,
    %c0_72 = arith.constant 0 : index
    %c0_73 = arith.constant 0 : index
    %143 = vector.load %arg16[%c0_72, %c0_73] : memref<2x32xf32, #tpu.memory_space<vmem>>, vector<2x32xf32>
    tpu.vector_store %arg16[%c0_72, %c0_73], %44 {strides = array<i32>} : memref<2x32xf32, #tpu.memory_space<vmem>>, vector<2x32xf32>,
    %c0_74 = arith.constant 0 : index
    %c0_75 = arith.constant 0 : index
    %144 = vector.load %arg17[%c0_74, %c0_75] : memref<2x32xf32, #tpu.memory_space<vmem>>, vector<2x32xf32>
    tpu.vector_store %arg17[%c0_74, %c0_75], %73 {strides = array<i32>} : memref<2x32xf32, #tpu.memory_space<vmem>>, vector<2x32xf32>,
    %145 = arith.index_cast %arg0 : i32 to index
    %c0_76 = arith.constant 0 : index
    %c0_77 = arith.constant 0 : index
    %146 = vector.load %arg18[%145, %c0_76, %c0_77] : memref<5x2x32xf32, #tpu.memory_space<vmem>>, vector<1x2x32xf32>
    %147 = vector.shape_cast %146 : vector<1x2x32xf32> to vector<2x32xf32>
    %148 = vector.shape_cast %46 : vector<2x32xf32> to vector<1x2x32xf32>
    tpu.vector_store %arg18[%145, %c0_76, %c0_77], %148 {strides = array<i32>} : memref<5x2x32xf32, #tpu.memory_space<vmem>>, vector<1x2x32xf32>,
    return
  }
  func.func @transform_0(%arg0: i32) -> (i32, i32, i32) {
    %c0_i32 = arith.constant 0 : i32
    %c0_i32_0 = arith.constant 0 : i32
    %c0_i32_1 = arith.constant 0 : i32
    return %arg0, %c0_i32, %c0_i32_0 : i32, i32, i32
  }
  func.func @transform_1(%arg0: i32) -> (i32, i32, i32, i32) {
    %c0_i32 = arith.constant 0 : i32
    %c0_i32_0 = arith.constant 0 : i32
    %c0_i32_1 = arith.constant 0 : i32
    %c0_i32_2 = arith.constant 0 : i32
    return %arg0, %c0_i32, %c0_i32_0, %c0_i32_1 : i32, i32, i32, i32
  }
  func.func @transform_2(%arg0: i32) -> (i32, i32, i32) {
    %c0_i32 = arith.constant 0 : i32
    %c0_i32_0 = arith.constant 0 : i32
    %c0_i32_1 = arith.constant 0 : i32
    %c0_i32_2 = arith.constant 0 : i32
    return %c0_i32, %c0_i32_0, %c0_i32_1 : i32, i32, i32
  }
  func.func @transform_3(%arg0: i32) -> (i32, i32, i32) {
    %c0_i32 = arith.constant 0 : i32
    %c0_i32_0 = arith.constant 0 : i32
    %c0_i32_1 = arith.constant 0 : i32
    %c0_i32_2 = arith.constant 0 : i32
    return %c0_i32, %c0_i32_0, %c0_i32_1 : i32, i32, i32
  }
  func.func @transform_4(%arg0: i32) -> (i32, i32) {
    %c0_i32 = arith.constant 0 : i32
    %c0_i32_0 = arith.constant 0 : i32
    %c0_i32_1 = arith.constant 0 : i32
    return %c0_i32, %c0_i32_0 : i32, i32
  }
  func.func @transform_5(%arg0: i32) -> (i32, i32, i32) {
    %c0_i32 = arith.constant 0 : i32
    %c0_i32_0 = arith.constant 0 : i32
    %c0_i32_1 = arith.constant 0 : i32
    %c0_i32_2 = arith.constant 0 : i32
    return %c0_i32, %c0_i32_0, %c0_i32_1 : i32, i32, i32
  }
  func.func @transform_6(%arg0: i32) -> (i32, i32) {
    %c0_i32 = arith.constant 0 : i32
    %c0_i32_0 = arith.constant 0 : i32
    %c0_i32_1 = arith.constant 0 : i32
    return %c0_i32, %c0_i32_0 : i32, i32
  }
  func.func @transform_7(%arg0: i32) -> (i32, i32) {
    %c0_i32 = arith.constant 0 : i32
    %c0_i32_0 = arith.constant 0 : i32
    %c0_i32_1 = arith.constant 0 : i32
    return %c0_i32, %c0_i32_0 : i32, i32
  }
  func.func @transform_8(%arg0: i32) -> (i32, i32) {
    %c0_i32 = arith.constant 0 : i32
    %c0_i32_0 = arith.constant 0 : i32
    %c0_i32_1 = arith.constant 0 : i32
    return %c0_i32, %c0_i32_0 : i32, i32
  }
  func.func @transform_9(%arg0: i32) -> (i32, i32) {
    %c0_i32 = arith.constant 0 : i32
    %c0_i32_0 = arith.constant 0 : i32
    %c0_i32_1 = arith.constant 0 : i32
    return %c0_i32, %c0_i32_0 : i32, i32
  }
  func.func @transform_10(%arg0: i32) -> (i32, i32) {
    %c0_i32 = arith.constant 0 : i32
    %c0_i32_0 = arith.constant 0 : i32
    %c0_i32_1 = arith.constant 0 : i32
    return %c0_i32, %c0_i32_0 : i32, i32
  }
  func.func @transform_11(%arg0: i32) -> (i32, i32) {
    %c0_i32 = arith.constant 0 : i32
    %c0_i32_0 = arith.constant 0 : i32
    %c0_i32_1 = arith.constant 0 : i32
    return %c0_i32, %c0_i32_0 : i32, i32
  }
  func.func @transform_12(%arg0: i32) -> (i32, i32) {
    %c0_i32 = arith.constant 0 : i32
    %c0_i32_0 = arith.constant 0 : i32
    %c0_i32_1 = arith.constant 0 : i32
    return %c0_i32, %c0_i32_0 : i32, i32
  }
  func.func @transform_13(%arg0: i32) -> (i32, i32) {
    %c0_i32 = arith.constant 0 : i32
    %c0_i32_0 = arith.constant 0 : i32
    %c0_i32_1 = arith.constant 0 : i32
    return %c0_i32, %c0_i32_0 : i32, i32
  }
}

</mosaic_0001>

<bundles_post_ra>
// kernel: forward.1
= control target key start
LH: loop header
LB: loop body
LE: loop exit
PB: predicated region body
PF: predicated region fallthrough
CT: control target
= control target key end

     0   :  { %s2102_s25 = smov 0   ;;  %s2406_s0 = inlined_call_operand.vmem [shape: f32[5,2,160], index: 0, kind: input, shape index: {}]   ;;  %s2407_s1 = inlined_call_operand.vmem [shape: f32[5,5,2,1], index: 1, kind: input, shape index: {}]   ;;  %s2408_s2 = inlined_call_operand.vmem [shape: f32[2,8,32], index: 2, kind: input, shape index: {}]   ;;  %s2409_s3 = inlined_call_operand.vmem [shape: f32[2,8,32], index: 3, kind: input, shape index: {}]   ;;  %s2410_s4 = inlined_call_operand.vmem [shape: f32[2,8], index: 4, kind: input, shape index: {}]   ;;  %s2411_s5 = inlined_call_operand.vmem [shape: f32[2,7,32], index: 5, kind: input, shape index: {}]   ;;  %s2412_s6 = inlined_call_operand.vmem [shape: f32[2,6], index: 6, kind: input, shape index: {}]   ;;  %s2413_s7 = inlined_call_operand.vmem [shape: f32[96,128], index: 7, kind: input, shape index: {}]   ;;  %s2414_s8 = inlined_call_operand.vmem [shape: f32[64,32], index: 8, kind: input, shape index: {}]   ;;  %s2415_s9 = inlined_call_operand.vmem [shape: f32[32,128], index: 9, kind: input, shape index: {}]   ;;  %s2416_s10 = inlined_call_operand.vmem [shape: f32[1,128], index: 10, kind: input, shape index: {}]   ;;  %s2417_s11 = inlined_call_operand.vmem [shape: f32[128,20], index: 11, kind: input, shape index: {}]   ;;  %s2418_s12 = inlined_call_operand.vmem [shape: f32[1,20], index: 12, kind: input, shape index: {}]   ;;  %s2419_s13 = inlined_call_operand.vmem [shape: f32[2,128], index: 13, kind: output, shape index: {}]  }
   0x1 LB: > { %s2108_s26 = sadd.s32 4294967295, %s2016_s25   ;;  %p1685_p0 = scmp.ge.s32.totalorder %s2016_s25, 1  ;;  %s2016_s25 = sphi %s2102_s25, %s23_s25  }
   0x2   : > { %p392_p1 = scmp.lt.s32.totalorder %s2016_s25, 6 }
   0x4   : > { %p393_p2 = pnand %p1685_p0, %p392_p1 }
   0x5   : > { %p436_p3 = scmp.lt.s32.totalorder (!%p393_p2), %s2108_s26, 4  ;;  %p1689_p4 = scmp.ne.s32.totalorder (!%p393_p2), %s2108_s26, 0 }
   0x6   : > { %396 = sbr.rel (%p393_p2) target bundleno = 2990 (0xbae), region = 72 }
   0xd   : > { %s437_s27 = scalar_select %p436_p3, %s2108_s26, 4 }
   0xe   : > { %449 = sbr.rel (%p1689_p4) target bundleno = 21 (0x15), region = 76  ;;  %vm450_vm0 = vcmask (!%p1689_p4), 254976   ;;  %v2018_v0 = vmov (!%p1689_p4), 0.0  }
   0xf   : > { %s1712_s28 = sshll.u32 %s437_s27, 2  ;;  %s1951_s29 = smul.u32 10, %s437_s27  ;;  %451 = vst.msk [vmem:[#allocation2] sm:$0x3] (!%p1689_p4), %vm450_vm0, %v2018_v0  ;;  %452 = vst.msk [vmem:[#allocation3] sm:$0x3] (!%p1689_p4), %vm450_vm0, %v2018_v0 }
  0x10   : > { %s2117_s15 = scalar_lea.vmem %s2406_s0, %s1712_s28  ;;  %453 = vst.msk [vmem:[#allocation4] sm:$0x3] (!%p1689_p4), %vm450_vm0, %v2018_v0  ;;  %454 = vst.msk [vmem:[#allocation5] sm:$0x3] (!%p1689_p4), %vm450_vm0, %v2018_v0 }
  0x11   : > { %s445_s18 = scalar_lea.vmem %s2407_s1, %s1951_s29  ;;  %455 = vst.msk [vmem:[#allocation5 + $0x2] sm:$0x3] (!%p1689_p4), %vm450_vm0, %v2018_v0  ;;  %456 = vst.msk [vmem:[#allocation5 + $0x4] sm:$0x3] (!%p1689_p4), %vm450_vm0, %v2018_v0 }
  0x12   : > { %457 = vst.msk [vmem:[#allocation5 + $0x6] sm:$0x3] (!%p1689_p4), %vm450_vm0, %v2018_v0  ;;  %458 = vst.msk [vmem:[#allocation5 + $0x8] sm:$0x3] (!%p1689_p4), %vm450_vm0, %v2018_v0 }
  0x13   : > { %459 = vst [vmem:[%s2419_s13] sm:$0x3] (!%p1689_p4), %v2018_v0 }
  0x15 PF: > { %v468_v1 = vld [vmem:[%s445_s18 + $0x4] sm:$0x3]  ;;  %v466_v2 = vld [vmem:[%s445_s18] sm:$0x3]  ;;  %v2019_v3 = vmov 0   ;;  %v526_v9 = vld [vmem:[%s2413_s7 + $0x8] sm:$0xff] }
  0x16   : > { %1975 = vset.pattern.permute.xlu1 %v2019_v3  ;;  %1974 = vset.pattern.permute.xlu0 %v2019_v3  ;;  %v469_v4 = vld [vmem:[%s445_s18 + $0x6] sm:$0x3]  ;;  %v467_v5 = vld [vmem:[%s445_s18 + $0x2] sm:$0x3]  ;;  %v470_v6 = vld [vmem:[%s445_s18 + $0x8] sm:$0x3] }
  0x17   : > { %483 = vperm.xlu1 %1975, %v468_v1   ;;  %473 = vperm.xlu0 %1974, %v466_v2   ;;  %v512_v7 = vld [vmem:[#allocation2] sm:$0x3]  ;;  %s2020_s27 = smov 64   ;;  %v2021_v10 = vmov 0.0|0.0   ;;  %v527_v12 = vld [vmem:[%s2413_s7 + $0x10] sm:$0xff]  ;;  %v528_v13 = vld [vmem:[%s2413_s7 + $0x18] sm:$0xff] }
  0x18   : > { %v525_v8 = vld [vmem:[%s2413_s7] sm:$0xff]  ;;  %1891 = vmatprep.subr.bf16.mxu0 %v2021_v10  ;;  %v1895_v14 = vpack.c.bf16 %v528_v13, %v527_v12  ;;  %v530_v16 = vld [vmem:[%s2413_s7 + $0x28] sm:$0xff]  ;;  %v531_v18 = vld [vmem:[%s2413_s7 + $0x30] sm:$0xff]  ;;  %vm501_vm1 = vcmask 254976   ;;  %vm2022_vm2 = vmmov 0   ;;  %v2023_v38 = vmov 0.0  }
  0x19   : > { %v1892_v11 = vpack.c.bf16 %v526_v9, %v525_v8  ;;  %v529_v15 = vld [vmem:[%s2413_s7 + $0x20] sm:$0xff]  ;;  %v532_v19 = vld [vmem:[%s2413_s7 + $0x38] sm:$0xff]  ;;  %v534_v22 = vld [vmem:[%s2413_s7 + $0x48] sm:$0xff]  ;;  %1793 = vmatprep.mubr.msk.f32.mxu0 %vm2022_vm2, %v2023_v38  ;;  %1796 = vmatprep.subr.mxu1 %v2023_v38  ;;  %s2024_s19 = smov 32   ;;  %vm521_vm3 = vcmask 261120   ;;  %vm523_vm4 = vcmask 523264  }
  0x1a   : > { %v1898_v17 = vpack.c.bf16 %v530_v16, %v529_v15  ;;  %v1901_v20 = vpack.c.bf16 %v532_v19, %v531_v18  ;;  %v533_v21 = vld [vmem:[%s2413_s7 + $0x40] sm:$0xff]  ;;  %v535_v24 = vld [vmem:[%s2413_s7 + $0x50] sm:$0xff]  ;;  %v536_v25 = vld [vmem:[%s2413_s7 + $0x58] sm:$0xff]  ;;  %1798 = vmatprep.mubr.msk.f32.mxu1 %vm2022_vm2, %v2023_v38  ;;  %vm537_vm5 = vcmask 785408   ;;  %v2025_v12 = vmov 1966171168  }
  0x1b   : > { %488 = vperm.xlu1 %1975, %v469_v4   ;;  %478 = vperm.xlu0 %1974, %v467_v5   ;;  %v1904_v23 = vpack.c.bf16 %v534_v22, %v533_v21  ;;  %v1907_v26 = vpack.c.bf16 %v536_v25, %v535_v24  ;;  %v461_v29 = vld [vmem:[#allocation5] sm:$0x3]  ;;  %v463_v30 = vld [vmem:[#allocation5 + $0x4] sm:$0x3]  ;;  %v462_v31 = vld [vmem:[#allocation5 + $0x2] sm:$0x3]  ;;  %v650_v13 = vunpack.c.l.s4 %v2025_v12 }
  0x1c   : > { %1893 = vmatpush3.bf16.msra.mxu0 %v1892_v11  ;;  %v464_v34 = vld [vmem:[#allocation5 + $0x6] sm:$0x3]  ;;  %v1692_v39 = vld.sshfl [vmem:[#allocation3] sm:$0x3 pattern:$0x76325410] }
  0x1d   : > { %1894 = vmatprep.subr.bf16.mxu0 %v2021_v10  ;;  %v465_v40 = vld [vmem:[#allocation5 + $0x8] sm:$0x3]  ;;  %v511_v53 = vld [vmem:[#allocation4] sm:$0x3]  ;;  %v2187_v58 = vld [vmem:[%s2117_s15] sm:$0xf]  ;;  %v651_v15 = vunpack.c.0.s8 %v650_v13 }
  0x1e   : > { %v657_v9 = vld [vmem:[%s2409_s3] sm:$0xff]  ;;  %v658_v25 = vld [vmem:[%s2409_s3 + $0x8] sm:$0xff]  ;;  %vm826_vm6 = vcmask 1041409   ;;  %vm830_vm8 = vcmask 58368   ;;  %s1709_s29 = sshll.u32 %s2108_s26, 1  ;;  %vm867_vm9 = vcmask 64512  }
  0x1f   : > { %493 = vperm.xlu0 %1974, %v470_v6   ;;  %1797 = vmatpush3.xpose.msk.msra.mxu1 %vm521_vm3, %v657_v9  ;;  %s1638_s30 = scalar_lea.vmem [#allocation5], %s1709_s29  ;;  %vm1520_vm10 = vcmask 1043459   ;;  %vm1522_vm11 = vcmask 1045509   ;;  %vm1524_vm12 = vcmask 1047559   ;;  %vm1584_vm14 = vcmask 41984   ;;  %s2029_s15 = smov 122  }
  0x20   : > { %1896 = vmatpush3.bf16.msra.mxu0 %v1895_v14  ;;  %1801 = vmatprep.subr.mxu1 %v2023_v38  ;;  %v652_v14 = vlaneseq  ;;  %vm1290_vm15 = vcmask 156672   ;;  %s2030_s20 = smov 102  }
  0x21   : > { %1897 = vmatprep.subr.bf16.mxu0 %v2021_v10 }
  0x22   : > { %v2201_v16 = vshrl.u32 %v652_v14, 7 }
  0x23   : > { %518 = vrot.lane.b32.xlu0 %v512_v7, %s2020_s27 }
  0x24   : > { %1899 = vmatpush3.bf16.msra.mxu0 %v1898_v17  ;;  %v2204_v17 = vsub.s32 %v651_v15, %v2201_v16 }
  0x25   : > { %1900 = vmatprep.subr.bf16.mxu0 %v2021_v10 }
  0x27   : > { %628 = vrot.lane.b32.xlu0 %v1692_v39, %s2024_s19 }
  0x28   : > { %1902 = vmatpush3.bf16.msra.mxu0 %v1901_v20  ;;  %v661_v20 = vsub.s32 0, %v2201_v16 }
  0x29   : > { %1903 = vmatprep.subr.bf16.mxu0 %v2021_v10 }
  0x2c   : > { %1905 = vmatpush3.bf16.msra.mxu0 %v1904_v23 }
  0x2d   : > { %1906 = vmatprep.subr.bf16.mxu0 %v2021_v10 }
  0x30   : > { %1908 = vmatpush3.bf16.msra.mxu0 %v1907_v26 }
  0x31   : > { %1927 = vmatprep.subr.bf16.mxu0 %v2021_v10 }
  0x96   : > { %v484_v27 = vpop.permute.xlu1 %483  ;;  %v474_v28 = vpop.permute.xlu0 %473 }
  0x97   : > { %v496_v32 = vmul.f32 %v474_v28, %v461_v29  ;;  %v498_v36 = vmul.f32 %v484_v27, %v463_v30  ;;  %v821_v30 = vld [vmem:[%s2410_s4] sm:$0x3] }
  0x98   : > { %vm822_vm7 = vcmp.gt.f32.partialorder %v821_v30, 0.5 }
  0x99   : > { %v502_v41 = vsel %vm501_vm1, %v496_v32, 0.0  ;;  %v505_v46 = vsel %vm501_vm1, %v498_v36, 0.0 }
  0x9a   : > { %v489_v33 = vpop.permute.xlu1 %488  ;;  %v479_v35 = vpop.permute.xlu0 %478 }
  0x9b   : > { %v497_v37 = vmul.f32 %v479_v35, %v462_v31  ;;  %v499_v42 = vmul.f32 %v489_v33, %v464_v34 }
  0x9d   : > { %v503_v43 = vsel %vm501_vm1, %v497_v37, 0.0  ;;  %v507_v49 = vsel %vm501_vm1, %v499_v42, 0.0 }
  0x9e   : > { %v504_v44 = vadd.f32 %v503_v43, %v502_v41  ;;  %v494_v45 = vpop.permute.xlu0 %493  ;;  %v2026_v43 = vmov 1983009808  }
  0x9f   : > { %v500_v47 = vmul.f32 %v494_v45, %v465_v40 }
  0xa0   : > { %v506_v48 = vadd.f32 %v505_v46, %v504_v44  ;;  %v1013_v44 = vunpack.c.l.s4 %v2026_v43  ;;  %v1325_v43 = vld [vmem:[%s2411_s5] sm:$0x7f] }
  0xa1   : > { %v509_v51 = vsel %vm501_vm1, %v500_v47, 0.0 }
  0xa2   : > { %v508_v50 = vadd.f32 %v507_v49, %v506_v48  ;;  %v519_v54 = vpop.permute.xlu0 %518  ;;  %v1014_v45 = vunpack.c.0.s8 %v1013_v44  ;;  %v865_v48 = vld [vmem:[%s2408_s2] sm:$0xff] }
  0xa4   : > { %v510_v52 = vadd.f32 %v509_v51, %v508_v50  ;;  %v2226_v46 = vsub.s32 %v1014_v45, %v2201_v16 }
  0xa6   : > { %514 = vrot.lane.b32.xlu1 %v510_v52, %s2024_s19  ;;  %v629_v5 = vpop.permute.xlu0 %628 }
 0x118   : > { %v515_v55 = vpop.permute.xlu1 %514 }
 0x119   : > { %v522_v56 = vsel %vm521_vm3, %v511_v53, %v515_v55  ;;  %v866_v55 = vld [vmem:[%s2408_s2 + $0x8] sm:$0xff] }
 0x11a   : > { %v524_v57 = vsel %vm523_vm4, %v522_v56, %v519_v54 }
 0x11b   : > { %1794 = vmatmul.mubr.msk.f32.vlgmr.msra.gmra.mrb[0].mxu0 %vm537_vm5, %v524_v57 }
 0x11c   : > { %1878 = vmatprep.mubr.msk.f32.mxu0 %vm2022_vm2, %v2023_v38 }
 0x1ee   : > { %v607_v59 = vpop.f32.mrb[0].mxu0 }
 0x1ef   : > { %v611_v60 = vadd.f32 %v607_v59, %v2187_v58  ;;  %v1795_v61 = vpop.f32.mrb[1].mxu0  ;;  %v1030_v59 = vld [vmem:[%s2414_s8] sm:$0xff] }
 0x1f0   : > { %v1032_v61 = vld [vmem:[%s2414_s8 + $0x10] sm:$0xff] }
 0x1f1   : > { %1978 = vtanh.f32 %v611_v60  ;;  %v1691_v63 = vmul.f32 -1.442695, %v611_v60  ;;  %v1031_v60 = vld [vmem:[%s2414_s8 + $0x8] sm:$0xff] }
 0x1f3   : > { %1980 = vpow2.f32 %v1691_v63  ;;  %v1033_v63 = vld [vmem:[%s2414_s8 + $0x18] sm:$0xff] }
 0x1fb   : > { %v1979_v62 = vpop.eup %1978 }
 0x1fc   : > { %633 = vrot.lane.b32.xlu1 %v1979_v62, %s2020_s27  ;;  %v1910_v62 = vpack.c.bf16 %v1031_v60, %v1030_v59  ;;  %v2027_v59 = vmov 6   ;;  %v1700_v60 = vld [vmem:[%s2416_s10] ss:$0 sm:$0xff] }
 0x1fd   : > { %v1981_v0 = vpop.eup %1980  ;;  %1976 = vset.pattern.permute.xlu1 %v2027_v59  ;;  %1977 = vset.pattern.permute.xlu0 %v2027_v59  ;;  %v1603_v59 = vrot.slane %v2187_v58, %v2226_v46 }
 0x1fe   : > { %v615_v1 = vadd.f32 1.0, %v1981_v0  ;;  %v1913_v0 = vpack.c.bf16 %v1033_v63, %v1032_v61 }
 0x200   : > { %1982 = vrcp.f32 %v615_v1  ;;  %v1034_v1 = vld [vmem:[%s2414_s8 + $0x20] sm:$0xff] }
 0x20a   : > { %v1983_v2 = vpop.eup %1982 }
 0x20b   : > { %v631_v6 = vmul.f32 %v1983_v2, %v629_v5  ;;  %v1037_v5 = vld [vmem:[%s2414_s8 + $0x38] sm:$0xff] }
 0x26e   : > { %v634_v3 = vpop.permute.xlu1 %633 }
 0x26f   : > { %v636_v4 = vmul.f32 %v1983_v2, %v634_v3 }
 0x271   : > { %638 = vrot.lane.b32.xlu1 %v636_v4, %s2024_s19  ;;  %v1036_v4 = vld [vmem:[%s2414_s8 + $0x30] sm:$0xff] }
 0x2e3   : > { %v639_v7 = vpop.permute.xlu1 %638 }
 0x2e4   : > { %v2192_v8 = vadd.f32 %v639_v7, %v631_v6  ;;  %v1919_v6 = vpack.c.bf16 %v1037_v5, %v1036_v4 }
 0x2e6   : > { %1984 = vtanh.f32 %v2192_v8 }
 0x2f0   : > { %v1985_v11 = vpop.eup %1984 }
 0x2f1   : > { %644 = vrot.lane.b32.xlu0 %v1985_v11, %s2020_s27 }
 0x363   : > { %v645_v18 = vpop.permute.xlu0 %644 }
 0x364   : > { %v647_v19 = vmul.f32 %v1983_v2, %v645_v18  ;;  %v1035_v2 = vld [vmem:[%s2414_s8 + $0x28] sm:$0xff] }
 0x365   : > { %v1916_v3 = vpack.c.bf16 %v1035_v2, %v1034_v1 }
 0x366   : > { %v655_v21 = vrot.slane %v647_v19, %v2204_v17  ;;  %v1018_v47 = vrot.slane %v647_v19, %v2226_v46  ;;  %v1112_v19 = vld [vmem:[%s2415_s9] sm:$0xff] }
 0x368   : > { %v656_v22 = vcombine.high %v655_v21, %v655_v21  ;;  %v662_v23 = vrot.slane %v655_v21, %v661_v20 }
 0x36a   : > { %663 = vrot.lane.b32.xlu1 %v662_v23, %s2024_s19  ;;  %v743_v24 = vrot.slane %v656_v22, %v661_v20  ;;  %v1113_v20 = vld [vmem:[%s2415_s9 + $0x8] sm:$0xff]  ;;  %v1114_v22 = vld [vmem:[%s2415_s9 + $0x10] sm:$0xff]  ;;  %v1115_v23 = vld [vmem:[%s2415_s9 + $0x18] sm:$0xff] }
 0x36b   : > { %v1922_v21 = vpack.c.bf16 %v1113_v20, %v1112_v19 }
 0x36c   : > { %744 = vrot.lane.b32.xlu0 %v743_v24, %s2024_s19  ;;  %v1925_v24 = vpack.c.bf16 %v1115_v23, %v1114_v22 }
 0x3dc   : > { %v664_v26 = vpop.permute.xlu1 %663 }
 0x3dd   : > { %1799 = vmatmul.mubr.msk.f32.vlgmr.msra.gmra.mrb[0].mxu1 %vm521_vm3, %v664_v26  ;;  %v1198_v26 = vld [vmem:[%s2417_s11 + $0x8] sm:$0xff] }
 0x3de   : > { %1802 = vmatpush3.xpose.msk.msra.mxu1 %vm521_vm3, %v658_v25  ;;  %1803 = vmatprep.mubr.msk.f32.mxu1 %vm2022_vm2, %v2023_v38  ;;  %v745_v27 = vpop.permute.xlu0 %744  ;;  %v1197_v25 = vld [vmem:[%s2417_s11] sm:$0xff] }
 0x3df   : > { %1806 = vmatprep.subr.mxu1 %v2023_v38 }
 0x3e1   : > { %1804 = vmatmul.mubr.msk.f32.vlgmr.msra.gmra.mrb[2].mxu1 %vm521_vm3, %v745_v27  ;;  %v1199_v27 = vld [vmem:[%s2417_s11 + $0x10] sm:$0xff] }
 0x3e2   : > { %1808 = vmatprep.mubr.msk.f32.mxu1 %vm2022_vm2, %v2023_v38  ;;  %1807 = vmatpush3.msra.mxu1 %v865_v48  ;;  %v1326_v48 = vld [vmem:[%s2411_s5 + $0x8] sm:$0x7f] }
 0x3e3   : > { %1811 = vmatprep.subr.mxu1 %v2023_v38 }
 0x4b0   : > { %v736_v28 = vpop.f32.mrb[0].mxu1 }
 0x4b1   : > { %v1800_v29 = vpop.f32.mrb[1].mxu1 }
 0x4b2   : > { %v1200_v29 = vld [vmem:[%s2417_s11 + $0x18] sm:$0xff] }
 0x4b3   : > { %v1931_v30 = vpack.c.bf16 %v1200_v29, %v1199_v27 }
 0x4b4   : > { %v817_v31 = vpop.f32.mrb[2].mxu1 }
 0x4b5   : > { %v825_v32 = vrot.slane %v817_v31, 7  ;;  %v1805_v33 = vpop.f32.mrb[3].mxu1  ;;  %v1201_v31 = vld [vmem:[%s2417_s11 + $0x20] sm:$0xff] }
 0x4b7   : > { %v827_v34 = vsel %vm826_vm6, %v825_v32, %v736_v28  ;;  %v1928_v28 = vpack.c.bf16 %v1198_v26, %v1197_v25  ;;  %v1202_v32 = vld [vmem:[%s2417_s11 + $0x28] sm:$0xff] }
 0x4b8   : > { %v829_v35 = vsel %vm822_vm7, %v827_v34, -1e+30  ;;  %v1934_v33 = vpack.c.bf16 %v1202_v32, %v1201_v31  ;;  %v1203_v34 = vld [vmem:[%s2417_s11 + $0x30] sm:$0xff] }
 0x4b9   : > { %v831_v36 = vsel %vm830_vm8, %v829_v35, -inf  ;;  %1929 = vmatpush3.bf16.msra.mxu0 %v1928_v28 }
 0x4ba   : > { %832 = vmax.xlane.f32.xlu1 %v831_v36  ;;  %1930 = vmatprep.subr.bf16.mxu0 %v2021_v10 }
 0x4bd   : > { %1932 = vmatpush3.bf16.msra.mxu0 %v1931_v30  ;;  %v1498_v30 = vrot.slane %v2187_v58, 2 }
 0x4be   : > { %1933 = vmatprep.subr.bf16.mxu0 %v2021_v10 }
 0x4c1   : > { %1935 = vmatpush3.bf16.msra.mxu0 %v1934_v33 }
 0x4c2   : > { %1936 = vmatprep.subr.bf16.mxu0 %v2021_v10 }
 0x547   : > { %v833_v37 = vpop.xlane.xlu1 %832 }
 0x548   : > { %v834_v39 = vsub.f32 %v829_v35, %v833_v37  ;;  %v1204_v35 = vld [vmem:[%s2417_s11 + $0x38] sm:$0xff]  ;;  %v1205_v37 = vld [vmem:[%s2417_s11 + $0x40] sm:$0xff] }
 0x549   : > { %v1937_v36 = vpack.c.bf16 %v1204_v35, %v1203_v34 }
 0x54a   : > { %v835_v40 = vmul.f32 1.442695, %v834_v39  ;;  %v1206_v39 = vld [vmem:[%s2417_s11 + $0x48] sm:$0xff] }
 0x54b   : > { %1938 = vmatpush3.bf16.msra.mxu0 %v1937_v36 }
 0x54c   : > { %1986 = vpow2.f32 %v835_v40  ;;  %v1940_v40 = vpack.c.bf16 %v1206_v39, %v1205_v37  ;;  %1939 = vmatprep.subr.bf16.mxu0 %v2021_v10 }
 0x54f   : > { %1941 = vmatpush3.bf16.msra.mxu0 %v1940_v40 }
 0x550   : > { %1942 = vmatprep.subr.bf16.mxu0 %v2021_v10 }
 0x556   : > { %v1987_v41 = vpop.eup %1986 }
 0x557   : > { %v837_v42 = vsel %vm830_vm8, %v1987_v41, 0.0 }
 0x558   : > { %838 = vadd.xlane.f32.xlu0 %v837_v42 }
 0x56e   : > { %1019 = vrot.lane.b32.xlu0 %v1018_v47, %s2024_s19 }
 0x5e5   : > { %v839_v49 = vpop.xlane.xlu0 %838 }
 0x5e6   : > { %1988 = vrcp.f32 %v839_v49 }
 0x5e9   : > { %v1020_v50 = vpop.permute.xlu0 %1019 }
 0x5ea   : > { %1623 = vst.msk [vmem:[#allocation2] sm:$0x3] %vm501_vm1, %v1020_v50  ;;  %1639 = vst.msk [vmem:[%s1638_s30] sm:$0x3] %vm501_vm1, %v1020_v50 }
 0x5f0   : > { %v1989_v51 = vpop.eup %1988 }
 0x5f1   : > { %v841_v52 = vmul.f32 %v1989_v51, %v1987_v41  ;;  %v1207_v51 = vld [vmem:[%s2417_s11 + $0x50] sm:$0xff] }
 0x5f3   : > { %v849_v53 = vrot.slane %v841_v52, %v2204_v17  ;;  %v1208_v52 = vld [vmem:[%s2417_s11 + $0x58] sm:$0xff] }
 0x5f5   : > { %v857_v54 = vrot.slane %v849_v53, %v2204_v17  ;;  %v850_v56 = vcombine.high %v849_v53, %v849_v53  ;;  %v1943_v53 = vpack.c.bf16 %v1208_v52, %v1207_v51 }
 0x5f7   : > { %1809 = vmatmul.mubr.msk.f32.vlgmr.msra.gmra.mrb[4].mxu1 %vm867_vm9, %v857_v54  ;;  %v864_v57 = vrot.slane %v850_v56, %v2204_v17  ;;  %1944 = vmatpush3.bf16.msra.mxu0 %v1943_v53  ;;  %v1212_v56 = vld [vmem:[%s2417_s11 + $0x78] sm:$0xff] }
 0x5f8   : > { %1812 = vmatpush3.msra.mxu1 %v866_v55  ;;  %1813 = vmatprep.mubr.msk.f32.mxu1 %vm2022_vm2, %v2023_v38  ;;  %v1211_v55 = vld [vmem:[%s2417_s11 + $0x70] sm:$0xff] }
 0x5f9   : > { %1909 = vmatprep.subr.bf16.mxu1 %v2021_v10  ;;  %1945 = vmatprep.subr.bf16.mxu0 %v2021_v10 }
 0x5fb   : > { %1814 = vmatmul.mubr.msk.f32.vlgmr.msra.gmra.mrb[6].mxu1 %vm867_vm9, %v864_v57  ;;  %v1949_v57 = vpack.c.bf16 %v1212_v56, %v1211_v55 }
 0x5fc   : > { %1832 = vmatprep.mubr.msk.f32.mxu1 %vm2022_vm2, %v2023_v38  ;;  %1911 = vmatpush3.bf16.msra.mxu1 %v1910_v62 }
 0x5fd   : > { %1912 = vmatprep.subr.bf16.mxu1 %v2021_v10 }
 0x600   : > { %1914 = vmatpush3.bf16.msra.mxu1 %v1913_v0 }
 0x601   : > { %1915 = vmatprep.subr.bf16.mxu1 %v2021_v10 }
 0x604   : > { %1917 = vmatpush3.bf16.msra.mxu1 %v1916_v3 }
 0x605   : > { %1918 = vmatprep.subr.bf16.mxu1 %v2021_v10 }
 0x608   : > { %1920 = vmatpush3.bf16.msra.mxu1 %v1919_v6 }
 0x609   : > { %1921 = vmatprep.subr.bf16.mxu1 %v2021_v10 }
 0x6ca   : > { %v936_v7 = vpop.f32.mrb[4].mxu1 }
 0x6cb   : > { %v1810_v9 = vpop.f32.mrb[5].mxu1 }
 0x6ce   : > { %v1008_v11 = vpop.f32.mrb[6].mxu1 }
 0x6cf   : > { %v1024_v12 = vrot.slane %v1008_v11, 7  ;;  %v1815_v13 = vpop.f32.mrb[7].mxu1 }
 0x6d1   : > { %v1025_v14 = vsel %vm826_vm6, %v1024_v12, %v936_v7 }
 0x6d2   : > { %1026 = vrot.lane.b32.xlu1 %v1025_v14, %s2024_s19  ;;  %s2031_s19 = smov 96  }
 0x744   : > { %v1027_v15 = vpop.permute.xlu1 %1026 }
 0x745   : > { %v1029_v18 = vsel %vm521_vm3, %v1020_v50, %v1027_v15 }
 0x746   : > { %1833 = vmatmul.mubr.msk.f32.vlgmr.msra.gmra.mrb[8].mxu1 %vm523_vm4, %v1029_v18  ;;  %v2028_v18 = vmov 269488144  }
 0x747   : > { %1843 = vmatprep.mubr.msk.f32.mxu1 %vm2022_vm2, %v2023_v38  ;;  %1923 = vmatpush3.bf16.msra.mxu1 %v1922_v21  ;;  %v1501_v19 = vunpack.c.l.s4 %v2028_v18 }
 0x748   : > { %1924 = vmatprep.subr.bf16.mxu1 %v2021_v10 }
 0x749   : > { %v1502_v20 = vunpack.c.0.s8 %v1501_v19 }
 0x74b   : > { %1926 = vmatpush3.bf16.msra.mxu1 %v1925_v24  ;;  %v1505_v21 = vsub.s32 %v1502_v20, %v2201_v16  ;;  %v1528_v16 = vsub.f32 1.0, %v1498_v30 }
 0x74c   : > { %1881 = vmatprep.subr.mxu1 %v2023_v38 }
 0x819   : > { %v1107_v41 = vpop.f32.mrb[8].mxu1 }
 0x81a   : > { %1990 = vtanh.f32 %v1107_v41  ;;  %v1834_v42 = vpop.f32.mrb[9].mxu1 }
 0x824   : > { %v1991_v44 = vpop.eup %1990 }
 0x825   : > { %1636 = vst.msk [vmem:[#allocation4] sm:$0x3] %vm501_vm1, %v1991_v44  ;;  %1844 = vmatmul.mubr.msk.f32.vlgmr.msra.gmra.mrb[10].mxu1 %vm521_vm3, %v1991_v44  ;;  %v1309_v45 = vrot.slane %v1991_v44, %v2204_v17 }
 0x826   : > { %1882 = vmatpush3.xpose.msk.msra.mxu1 %vm521_vm3, %v1325_v43  ;;  %1883 = vmatprep.mubr.msk.f32.mxu1 %vm2022_vm2, %v2023_v38 }
 0x827   : > { %v1317_v47 = vrot.slane %v1309_v45, %v2204_v17  ;;  %1886 = vmatprep.subr.mxu1 %v2023_v38  ;;  %v1310_v49 = vcombine.high %v1309_v45, %v1309_v45 }
 0x829   : > { %1884 = vmatmul.mubr.msk.f32.vlgmr.msra.gmra.mrb[12].mxu1 %vm521_vm3, %v1317_v47  ;;  %v1324_v50 = vrot.slane %v1310_v49, %v2204_v17  ;;  %v1210_v17 = vld [vmem:[%s2417_s11 + $0x68] sm:$0xff] }
 0x82a   : > { %1887 = vmatpush3.xpose.msk.msra.mxu1 %vm521_vm3, %v1326_v48  ;;  %1888 = vmatprep.mubr.msk.f32.mxu1 %vm2022_vm2, %v2023_v38  ;;  %v1209_v38 = vld [vmem:[%s2417_s11 + $0x60] sm:$0xff] }
 0x82b   : > { %v1946_v54 = vpack.c.bf16 %v1210_v17, %v1209_v38  ;;  %v1576_v48 = vld [vmem:[%s2412_s6] sm:$0x3] }
 0x82c   : > { %vm1577_vm13 = vcmp.gt.f32.partialorder %v1576_v48, 0.5  ;;  %v1702_v17 = vld [vmem:[%s2418_s12] ss:$0 sm:$0xff] }
 0x82d   : > { %1889 = vmatmul.mubr.msk.f32.vlgmr.msra.gmra.mrb[14].mxu1 %vm521_vm3, %v1324_v50  ;;  %1947 = vmatpush3.bf16.msra.mxu0 %v1946_v54 }
 0x82e   : > { %1948 = vmatprep.subr.bf16.mxu0 %v2021_v10 }
 0x831   : > { %1950 = vmatpush3.bf16.msra.mxu0 %v1949_v57 }
 0x8f8   : > { %v1192_v61 = vpop.f32.mrb[10].mxu1 }
 0x8f9   : > { %v1193_v62 = vadd.f32 %v1700_v60, %v1192_v61  ;;  %v1845_v10 = vpop.f32.mrb[11].mxu1  ;;  %v1604_v60 = vcombine.high %v1603_v59, %v1603_v59 }
 0x8fb   : > { %1992 = vtanh.f32 %v1193_v62 }
 0x8fc   : > { %v1398_v63 = vpop.f32.mrb[12].mxu1 }
 0x8fd   : > { %v1885_v0 = vpop.f32.mrb[13].mxu1  ;;  %v1707_v1 = vmul.f32 -1.442695, %v1398_v63 }
 0x8ff   : > { %1994 = vpow2.f32 %v1707_v1 }
 0x900   : > { %v1473_v2 = vpop.f32.mrb[14].mxu1 }
 0x901   : > { %v1708_v3 = vmul.f32 -1.442695, %v1473_v2  ;;  %v1890_v4 = vpop.f32.mrb[15].mxu1 }
 0x903   : > { %1996 = vpow2.f32 %v1708_v3 }
 0x905   : > { %v1993_v5 = vpop.eup %1992 }
 0x906   : > { %1879 = vmatmul.mubr.f32.vlgmr.msra.gmra.mrb[2].mxu0 %v1993_v5 }
 0x909   : > { %v1995_v6 = vpop.eup %1994 }
 0x90a   : > { %v1483_v11 = vadd.f32 1.0, %v1995_v6 }
 0x90d   : > { %v1997_v7 = vpop.eup %1996 }
 0x90e   : > { %v1484_v9 = vadd.f32 1.0, %v1997_v7 }
 0x910   : > { %1998 = vrcp.f32 %v1484_v9 }
 0x911   : > { %2000 = vrcp.f32 %v1483_v11 }
 0x91a   : > { %v1999_v12 = vpop.eup %1998 }
 0x91b   : > { %1495 = vperm.xlu1 %1976, %v1999_v12   ;;  %v1530_v13 = vsub.f32 1.0, %v1999_v12  ;;  %v2001_v14 = vpop.eup %2000 }
 0x91c   : > { %v1529_v15 = vsub.f32 1.0, %v2001_v14 }
 0x91d   : > { %1537 = vperm.xlu0 %1977, %v1530_v13  }
 0x91f   : > { %1491 = vperm.xlu1 %1976, %v2001_v14  }
 0x923   : > { %1533 = vperm.xlu1 %1976, %v1529_v15  }
 0x99a   : > { %v1496_v22 = vpop.permute.xlu1 %1495 }
 0x99b   : > { %v1513_v23 = vrot.slane %v1496_v22, %v1505_v21 }
 0x99c   : > { %v1538_v24 = vpop.permute.xlu0 %1537 }
 0x99d   : > { %v1518_v26 = vrot.slane %v1513_v23, 7  ;;  %v1552_v27 = vrot.slane %v1538_v24, %v1505_v21  ;;  %v1631_v23 = vrot.slane %v2192_v8, %v2226_v46 }
 0x99e   : > { %v1492_v25 = vpop.permute.xlu1 %1491 }
 0x99f   : > { %v1506_v28 = vrot.slane %v1492_v25, %v1505_v21  ;;  %v1555_v33 = vrot.slane %v1552_v27, 7  ;;  %v1620_v25 = vld [vmem:[%s2419_s13] sm:$0x3] }
 0x9a1   : > { %v1519_v29 = vsel %vm826_vm6, %v1518_v26, %v1506_v28 }
 0x9a2   : > { %v1521_v31 = vsel %vm1520_vm10, %v1518_v26, %v1519_v29  ;;  %v1534_v32 = vpop.permute.xlu1 %1533 }
 0x9a3   : > { %v1523_v34 = vsel %vm1522_vm11, %v1518_v26, %v1521_v31  ;;  %v1545_v35 = vrot.slane %v1534_v32, %v1505_v21 }
 0x9a4   : > { %v1525_v37 = vsel %vm1524_vm12, %v1518_v26, %v1523_v34 }
 0x9a5   : > { %v1556_v36 = vsel %vm826_vm6, %v1555_v33, %v1545_v35  ;;  %v1527_v42 = vmul.f32 %v1525_v37, %v1498_v30 }
 0x9a6   : > { %v1557_v39 = vsel %vm1520_vm10, %v1555_v33, %v1556_v36 }
 0x9a7   : > { %v1558_v40 = vsel %vm1522_vm11, %v1555_v33, %v1557_v39 }
 0x9a8   : > { %v1559_v41 = vsel %vm1524_vm12, %v1555_v33, %v1558_v40 }
 0x9a9   : > { %v1561_v43 = vmul.f32 %v1559_v41, %v1528_v16 }
 0x9ab   : > { %v1562_v44 = vadd.f32 %v1561_v43, %v1527_v42 }
 0x9ad   : > { %v1570_v45 = vrot.slane %v1562_v44, %v2226_v46 }
 0x9af   : > { %v1571_v47 = vrot.slane %v1570_v45, 1  ;;  %v1574_v50 = vmul.f32 %v1570_v45, %v1398_v63 }
 0x9b1   : > { %v1575_v49 = vmul.f32 %v1571_v47, %v1473_v2 }
 0x9b3   : > { %v1580_v51 = vrot.slane %v1575_v49, 7 }
 0x9b5   : > { %v1581_v52 = vsel %vm826_vm6, %v1580_v51, %v1574_v50 }
 0x9b6   : > { %v1583_v53 = vsel %vm1577_vm13, -1e+30, %v1581_v52 }
 0x9b7   : > { %v1585_v38 = vsel %vm1584_vm14, %v1583_v53, -inf }
 0x9b8   : > { %1586 = vmax.xlane.f32.xlu1 %v1585_v38 }
 0x9c9   : > { %1605 = vrot.lane.b32.xlu1 %v1604_v60, %s2029_s15 }
 0x9d9   : > { %v1286_v54 = vpop.f32.mrb[2].mxu0 }
 0x9da   : > { %v1287_v55 = vadd.f32 %v1702_v17, %v1286_v54  ;;  %v1880_v56 = vpop.f32.mrb[3].mxu0 }
 0x9dc   : > { %v1291_v57 = vsel %vm1290_vm15, %v1287_v55, -inf }
 0x9dd   : > { %1292 = vmax.xlane.f32.xlu0 %v1291_v57 }
 0xa45   : > { %v1587_v61 = vpop.xlane.xlu1 %1586 }
 0xa46   : > { %v1588_v62 = vsub.f32 %v1583_v53, %v1587_v61 }
 0xa48   : > { %v1589_v10 = vmul.f32 1.442695, %v1588_v62 }
 0xa49   : > { %v1606_v19 = vpop.permute.xlu1 %1605 }
 0xa4a   : > { %2002 = vpow2.f32 %v1589_v10 }
 0xa54   : > { %v2003_v63 = vpop.eup %2002 }
 0xa55   : > { %v1591_v0 = vsel %vm1584_vm14, %v2003_v63, 0.0 }
 0xa56   : > { %1592 = vadd.xlane.f32.xlu0 %v1591_v0 }
 0xa6a   : > { %v1293_v1 = vpop.xlane.xlu0 %1292 }
 0xa6b   : > { %v1294_v2 = vsub.f32 %v1287_v55, %v1293_v1 }
 0xa6d   : > { %v1295_v3 = vmul.f32 1.442695, %v1294_v2 }
 0xa6f   : > { %2004 = vpow2.f32 %v1295_v3 }
 0xa79   : > { %v2005_v4 = vpop.eup %2004 }
 0xa7a   : > { %v1297_v5 = vsel %vm1290_vm15, %v2005_v4, 0.0 }
 0xa7b   : > { %1298 = vadd.xlane.f32.xlu0 %v1297_v5 }
 0xa91   : > { %1612 = vrot.lane.b32.xlu0 %v1604_v60, %s2030_s20 }
 0xae3   : > { %v1593_v58 = vpop.xlane.xlu0 %1592 }
 0xae4   : > { %2006 = vlog2.f32 %v1593_v58 }
 0xaee   : > { %v2007_v6 = vpop.eup %2006 }
 0xaef   : > { %v1595_v7 = vmul.f32 0.6931472, %v2007_v6 }
 0xaf1   : > { %v1596_v11 = vsub.f32 %v1588_v62, %v1595_v7 }
 0xb08   : > { %v1299_v9 = vpop.xlane.xlu0 %1298 }
 0xb09   : > { %2008 = vlog2.f32 %v1299_v9 }
 0xb0c   : > { %v1613_v12 = vpop.permute.xlu0 %1612 }
 0xb0d   : > { %v1615_v13 = vmul.f32 %v1613_v12, %v1596_v11 }
 0xb0f   : > { %v1616_v14 = vsel %vm1584_vm14, %v1615_v13, 0.0 }
 0xb10   : > { %1617 = vadd.xlane.f32.xlu0 %v1616_v14 }
 0xb13   : > { %v2009_v15 = vpop.eup %2008 }
 0xb14   : > { %v1301_v18 = vmul.f32 0.6931472, %v2009_v15 }
 0xb16   : > { %v1302_v20 = vsub.f32 %v1294_v2, %v1301_v18 }
 0xb18   : > { %v1608_v21 = vmul.f32 %v1606_v19, %v1302_v20 }
 0xb1a   : > { %v1609_v22 = vsel %vm1290_vm15, %v1608_v21, 0.0 }
 0xb1b   : > { %1610 = vadd.xlane.f32.xlu1 %v1609_v22 }
 0xb2c   : > { %1632 = vrot.lane.b32.xlu1 %v1631_v23, %s2031_s19 }
 0xb9d   : > { %v1618_v24 = vpop.xlane.xlu0 %1617 }
 0xba8   : > { %v1611_v26 = vpop.xlane.xlu1 %1610 }
 0xba9   : > { %v1619_v27 = vadd.f32 %v1618_v24, %v1611_v26 }
 0xbab   : > { %v1621_v28 = vadd.f32 %v1620_v25, %v1619_v27 }
 0xbac   : > { %v1633_v29 = vpop.permute.xlu1 %1632 }
 0xbad   : > { %1622 = vst [vmem:[%s2419_s13] sm:$0x3] %v1621_v28  ;;  %1635 = vst.msk [vmem:[#allocation3] sm:$0x3] %vm501_vm1, %v1633_v29 }
 0xbae PF: > { %s23_s25 = sadd.s32 1, %s2016_s25  }
 0xbaf   : > { %p20_p5 = scmp.ge.s32.totalorder %s23_s25, 7  }
 0xbb1   :  { %22 = sbr.rel (!%p20_p5) target bundleno = 1 (0x1), region = 106 }

</bundles_post_ra>
